<compile_context>
chip_gen: v5e
topology: v5e:2x2
jax: 0.10.0
libtpu: 0.0.40
codegen_flags: <defaults>
</compile_context>

<pallas_src>
import jax
import jax.numpy as jnp
from jax import lax
from jax.experimental import pallas as pl
from jax.experimental.pallas import tpu as pltpu


def _round_up(n: int, m: int) -> int:
    return ((n + m - 1) // m) * m


def _cdiv(a: int, b: int) -> int:
    return (a + b - 1) // b


def _vmem_limit_bytes() -> int:
    """Chip-aware VMEM budget with headroom. Fallback is conservative (48 MiB)
    so it never exceeds v7x's 64 MiB physical VMEM per TensorCore."""
    try:
        cap = int(getattr(pltpu.get_tpu_info(), "vmem_capacity_bytes", 64 << 20))
    except Exception:
        cap = 64 << 20
    return max(32 << 20, min(100 << 20, cap - (16 << 20)))


def _default_batch_tile() -> int:
    """128-row M tile on v5e (128x128 MXU), 256 on v6e/v7x (256-wide MXU)."""
    try:
        kind = jax.devices()[0].device_kind.lower()
        if "v5 lite" in kind or "v5e" in kind or "v5litepod" in kind:
            return 128
    except Exception:
        pass
    return 256


def _const_spec(shape):
    """Constant-index_map BlockSpec (VMEM-resident), single-buffered."""
    rank = len(shape)
    idx = lambda *args: (0,) * rank  # noqa: E731  (works for 1-D and 2-D grids)
    try:
        return pl.BlockSpec(shape, idx, pipeline_mode=pl.Buffered(1))
    except TypeError:  # older API without pipeline_mode
        return pl.BlockSpec(shape, idx)


def _make_resident_kernel(depth: int, use_bf16: bool):
    """All weights VMEM-resident; single grid axis over batch tiles."""
    cdt = jnp.bfloat16 if use_bf16 else jnp.float32

    def kernel(x_ref, w1_ref, b1_ref, wb_ref, bb_ref, wl_ref, bl_ref, out_ref):
        # first_fc + ReLU (f32 MXU accumulation)
        y = jnp.dot(x_ref[...], w1_ref[...], preferred_element_type=jnp.float32)
        y = jnp.maximum(y + b1_ref[...], 0.0)

        def body(i, y):
            z = jnp.dot(y.astype(cdt), wb_ref[i], preferred_element_type=jnp.float32)
            return jnp.maximum(z + bb_ref[i], 0.0) + y  # relu(fc(y)) + y

        # fori_loop bounds live ranges; full unroll only for small depth.
        y = lax.fori_loop(0, depth, body, y, unroll=True if depth <= 8 else False)

        out = jnp.dot(y.astype(cdt), wl_ref[...], preferred_element_type=jnp.float32)
        out_ref[...] = (out + bl_ref[...]).astype(out_ref.dtype)

    return kernel


def _make_streaming_kernel(use_bf16: bool):
    """Second ("arbitrary") grid axis streams one residual-block weight slab
    per step; y carried in a per-batch-tile f32 VMEM scratch."""
    cdt = jnp.bfloat16 if use_bf16 else jnp.float32

    def kernel(x_ref, w1_ref, b1_ref, wb_ref, bb_ref, wl_ref, bl_ref, out_ref, y_ref):
        d = pl.program_id(1)

        @pl.when(d == 0)
        def _():
            y0 = jnp.dot(x_ref[...], w1_ref[...], preferred_element_type=jnp.float32)
            y_ref[...] = jnp.maximum(y0 + b1_ref[...], 0.0)

        y = y_ref[...]
        z = jnp.dot(y.astype(cdt), wb_ref[0], preferred_element_type=jnp.float32)
        y_ref[...] = jnp.maximum(z + bb_ref[0], 0.0) + y

        @pl.when(d == pl.num_programs(1) - 1)
        def _():
            out = jnp.dot(y_ref[...].astype(cdt), wl_ref[...],
                          preferred_element_type=jnp.float32)
            out_ref[...] = (out + bl_ref[...]).astype(out_ref.dtype)

    return kernel


def ml_mlp_forward(x, params, *, use_bf16: bool = True, batch_tile: int | None = None,
                   stream_depth: bool | None = None):
    """x: (B, input_dims) float32.  params: dict of weights (pre-transposed,
    unpadded logical shapes).  Returns (B, num_classes) float32 logits."""
    w1, b1 = params["w1"], params["b1"]          # (D_in, W), (1, W)
    wb, bb = params["wb"], params["bb"]          # (depth, W, W), (depth, 1, W)
    wl, bl = params["wl"], params["bl"]          # (W, C), (1, C)
    depth = wb.shape[0]
    batch, d_in = x.shape
    width = w1.shape[1]
    num_classes = wl.shape[1]

    # --- lane-dense padding (multiples of 128 on feature axes) --------------
    d_in_p = _round_up(d_in, 128)
    w_p = _round_up(width, 128)
    c_p = _round_up(num_classes, 128)

    wdt = jnp.bfloat16 if use_bf16 else jnp.float32
    itemsize = 2 if use_bf16 else 4
    sub = 16 if use_bf16 else 8            # bf16 packs 2 rows per sublane

    # --- balanced batch tiling ------------------------------------------------
    if batch_tile is None:
        batch_tile = _default_batch_tile()
    n_tiles = max(1, _cdiv(batch, batch_tile))
    if batch >= 2 * sub:                    # feed both v7x TCs / enable DMA overlap
        n_tiles = max(n_tiles, 2)
    n_tiles = min(n_tiles, max(1, _cdiv(batch, sub)))
    tb = _round_up(_cdiv(batch, n_tiles), sub)
    n_tiles = _cdiv(batch, tb)
    b_p = n_tiles * tb

    # --- pad + cast operands --------------------------------------------------
    x_p = jnp.pad(x, ((0, b_p - batch), (0, d_in_p - d_in))).astype(wdt)
    w1_p = jnp.pad(w1, ((0, d_in_p - d_in), (0, w_p - width))).astype(wdt)
    b1_p = jnp.pad(b1, ((0, 0), (0, w_p - width)))
    wb_p = jnp.pad(wb, ((0, 0), (0, w_p - width), (0, w_p - width))).astype(wdt)
    bb_p = jnp.pad(bb, ((0, 0), (0, 0), (0, w_p - width)))
    wl_p = jnp.pad(wl, ((0, w_p - width), (0, c_p - num_classes))).astype(wdt)
    bl_p = jnp.pad(bl, ((0, 0), (0, c_p - num_classes)))

    # --- resident vs. depth-streaming mode ------------------------------------
    vmem_limit = _vmem_limit_bytes()
    resident_weight_bytes = (d_in_p * w_p + depth * w_p * w_p + w_p * c_p) * itemsize
    if stream_depth is None:
        stream_depth = resident_weight_bytes > int(0.6 * vmem_limit)

    if not stream_depth:
        kernel = _make_resident_kernel(depth, use_bf16)
        grid = (n_tiles,)
        in_specs = [
            pl.BlockSpec((tb, d_in_p), lambda i: (i, 0)),
            _const_spec((d_in_p, w_p)),
            _const_spec((1, w_p)),
            _const_spec((depth, w_p, w_p)),
            _const_spec((depth, 1, w_p)),
            _const_spec((w_p, c_p)),
            _const_spec((1, c_p)),
        ]
        out_specs = pl.BlockSpec((tb, c_p), lambda i: (i, 0))
        scratch = []
        semantics = ("parallel",)
        weight_fetches = 1
    else:
        kernel = _make_streaming_kernel(use_bf16)
        grid = (n_tiles, depth)
        in_specs = [
            pl.BlockSpec((tb, d_in_p), lambda i, d: (i, 0)),
            _const_spec((d_in_p, w_p)),
            _const_spec((1, w_p)),
            pl.BlockSpec((1, w_p, w_p), lambda i, d: (d, 0, 0)),  # streamed
            pl.BlockSpec((1, 1, w_p), lambda i, d: (d, 0, 0)),
            _const_spec((w_p, c_p)),
            _const_spec((1, c_p)),
        ]
        out_specs = pl.BlockSpec((tb, c_p), lambda i, d: (i, 0))
        scratch = [pltpu.VMEM((tb, w_p), jnp.float32)]   # y carry across depth
        semantics = ("parallel", "arbitrary")
        weight_fetches = n_tiles

    # advisory cost estimate for XLA's scheduler
    flops = int(2 * b_p * (d_in_p * w_p + depth * w_p * w_p + w_p * c_p))
    bias_bytes = (w_p + depth * w_p + c_p) * 4
    bytes_accessed = int(b_p * d_in_p * itemsize + b_p * c_p * 4
                         + (resident_weight_bytes + bias_bytes) * weight_fetches)

    out = pl.pallas_call(
        kernel,
        out_shape=jax.ShapeDtypeStruct((b_p, c_p), jnp.float32),
        grid_spec=pltpu.PrefetchScalarGridSpec(
            num_scalar_prefetch=0,
            grid=grid,
            in_specs=in_specs,
            out_specs=out_specs,
            scratch_shapes=scratch,
        ),
        compiler_params=pltpu.CompilerParams(
            dimension_semantics=semantics,
            vmem_limit_bytes=vmem_limit,
        ),
        cost_estimate=pl.CostEstimate(
            flops=flops, transcendentals=0, bytes_accessed=bytes_accessed),
    )(x_p, w1_p, b1_p, wb_p, bb_p, wl_p, bl_p)

    # strip batch padding and padded class lanes
    return out[:batch, :num_classes]


def _ref_forward(x, params):
    """Pure-JAX reference for correctness checking."""
    y = jnp.maximum(x @ params["w1"] + params["b1"], 0.0)
    for i in range(params["wb"].shape[0]):
        y = jnp.maximum(y @ params["wb"][i] + params["bb"][i], 0.0) + y
    return y @ params["wl"] + params["bl"]


def init_params(key, input_dims, width, num_classes, depth):
    """Deterministic PyTorch-Linear-style init (uniform +/- 1/sqrt(fan_in)).
    Weights stored transposed: (in_features, out_features)."""
    ks = jax.random.split(key, 2 * depth + 4)

    def lin(kw, kb, fan_in, fan_out):
        bound = 1.0 / jnp.sqrt(fan_in)
        w = jax.random.uniform(kw, (fan_in, fan_out), jnp.float32, -bound, bound)
        b = jax.random.uniform(kb, (1, fan_out), jnp.float32, -bound, bound)
        return w, b

    w1, b1 = lin(ks[0], ks[1], input_dims, width)
    wbs, bbs = [], []
    for i in range(depth):
        w, b = lin(ks[2 + 2 * i], ks[3 + 2 * i], width, width)
        wbs.append(w)
        bbs.append(b)
    wl, bl = lin(ks[2 + 2 * depth], ks[3 + 2 * depth], width, num_classes)
    return {
        "w1": w1, "b1": b1,
        "wb": jnp.stack(wbs, axis=0),          # (depth, W, W)
        "bb": jnp.stack(bbs, axis=0),          # (depth, 1, W)
        "wl": wl, "bl": bl,
    }


if __name__ == "__main__":
    # Case 1: small shapes, resident-weight path.
    batch, input_dims, width, num_classes, depth = 8, 64, 32, 10, 4
    key = jax.random.PRNGKey(0)
    kx, kp = jax.random.split(key)
    x = jax.random.normal(kx, (batch, input_dims), jnp.float32)
    params = init_params(kp, input_dims, width, num_classes, depth)
    ref = _ref_forward(x, params)

    # Default: bf16 MXU inputs + f32 accumulation (v6e/v7x fast path).
    out = jax.block_until_ready(ml_mlp_forward(x, params))
    assert out.shape == (batch, num_classes)
    assert jnp.allclose(out, ref, atol=1e-1, rtol=1e-1), "bf16 mismatch vs reference"

    # Exact f32 path.
    out_f32 = jax.block_until_ready(ml_mlp_forward(x, params, use_bf16=False))
    assert jnp.allclose(out_f32, ref, atol=5e-3, rtol=5e-3), "f32 mismatch vs reference"

    # Case 2: batch not a tile multiple -> balanced 2-tile grid; depth > 8.
    batch2, depth2 = 300, 12
    kx2, kp2 = jax.random.split(jax.random.PRNGKey(1))
    x2 = jax.random.normal(kx2, (batch2, input_dims), jnp.float32)
    params2 = init_params(kp2, input_dims, width, num_classes, depth2)
    ref2 = _ref_forward(x2, params2)
    out2 = jax.block_until_ready(ml_mlp_forward(x2, params2, use_bf16=False))
    assert out2.shape == (batch2, num_classes)
    assert jnp.allclose(out2, ref2, atol=5e-3, rtol=5e-3), "f32 mismatch (gridded)"

    # Case 3: depth-streaming path (what auto-selects on v7x for big configs),
    # forced here to exercise the y-carry scratch + pl.when init/finalize.
    out3 = jax.block_until_ready(
        ml_mlp_forward(x2, params2, use_bf16=False, stream_depth=True))
    assert jnp.allclose(out3, ref2, atol=5e-3, rtol=5e-3), "f32 mismatch (streamed)"

    print("KERNEL_OK")
</pallas_src>

<mosaic_0001>
module attributes {stable_mosaic.version = 11 : i64} {
  func.func @kernel(%arg0: i32, %arg1: memref<16x128xbf16, #tpu.memory_space<vmem>>, %arg2: memref<128x128xbf16, #tpu.memory_space<vmem>>, %arg3: memref<1x128xf32, #tpu.memory_space<vmem>>, %arg4: memref<4x128x128xbf16, #tpu.memory_space<vmem>>, %arg5: memref<4x1x128xf32, #tpu.memory_space<vmem>>, %arg6: memref<128x128xbf16, #tpu.memory_space<vmem>>, %arg7: memref<1x128xf32, #tpu.memory_space<vmem>>, %arg8: memref<16x128xf32, #tpu.memory_space<vmem>>) attributes {dimension_semantics = [#tpu.dimension_semantics<parallel>], iteration_bounds = array<i64: 1>, scalar_prefetch = 0 : i64, scratch_operands = 0 : i64, tpu.core_type = #tpu.core_type<tc>, window_params = [{transform_indices = @transform_0, window_bounds = array<i64: 16, 128>}, {pipeline_mode = #tpu.pipeline_mode<synchronous>, transform_indices = @transform_1, window_bounds = array<i64: 128, 128>}, {pipeline_mode = #tpu.pipeline_mode<synchronous>, transform_indices = @transform_2, window_bounds = array<i64: 1, 128>}, {pipeline_mode = #tpu.pipeline_mode<synchronous>, transform_indices = @transform_3, window_bounds = array<i64: 4, 128, 128>}, {pipeline_mode = #tpu.pipeline_mode<synchronous>, transform_indices = @transform_4, window_bounds = array<i64: 4, 1, 128>}, {pipeline_mode = #tpu.pipeline_mode<synchronous>, transform_indices = @transform_5, window_bounds = array<i64: 128, 128>}, {pipeline_mode = #tpu.pipeline_mode<synchronous>, transform_indices = @transform_6, window_bounds = array<i64: 1, 128>}, {transform_indices = @transform_7, window_bounds = array<i64: 16, 128>}]} {
    %c0 = arith.constant 0 : index
    %c0_0 = arith.constant 0 : index
    %0 = vector.load %arg1[%c0, %c0_0] : memref<16x128xbf16, #tpu.memory_space<vmem>>, vector<16x128xbf16>
    %c0_1 = arith.constant 0 : index
    %c0_2 = arith.constant 0 : index
    %1 = vector.load %arg2[%c0_1, %c0_2] : memref<128x128xbf16, #tpu.memory_space<vmem>>, vector<128x128xbf16>
    %cst = arith.constant dense<0.000000e+00> : vector<16x128xf32>
    %2 = tpu.matmul %0, %1, %cst {dimension_numbers = #tpu.dot_dimension_numbers<[1], [0], [0], [1], [0, 0, 1, 1], [], []>} : vector<16x128xbf16>, vector<128x128xbf16>, vector<16x128xf32> -> vector<16x128xf32>
    %c0_3 = arith.constant 0 : index
    %c0_4 = arith.constant 0 : index
    %3 = vector.load %arg3[%c0_3, %c0_4] : memref<1x128xf32, #tpu.memory_space<vmem>>, vector<1x128xf32>
    %4 = vector.broadcast %3 : vector<1x128xf32> to vector<16x128xf32>
    %5 = arith.addf %2, %4 : vector<16x128xf32>
    %cst_5 = arith.constant 0.000000e+00 : f32
    %6 = vector.broadcast %cst_5 : f32 to vector<16x128xf32>
    %7 = arith.maximumf %5, %6 : vector<16x128xf32>
    %c0_i32 = arith.constant 0 : i32
    %8 = arith.truncf %7 : vector<16x128xf32> to vector<16x128xbf16>
    %9 = arith.index_cast %c0_i32 : i32 to index
    %c0_6 = arith.constant 0 : index
    %c0_7 = arith.constant 0 : index
    %10 = vector.load %arg4[%9, %c0_6, %c0_7] : memref<4x128x128xbf16, #tpu.memory_space<vmem>>, vector<1x128x128xbf16>
    %11 = vector.shape_cast %10 : vector<1x128x128xbf16> to vector<128x128xbf16>
    %cst_8 = arith.constant dense<0.000000e+00> : vector<16x128xf32>
    %12 = tpu.matmul %8, %11, %cst_8 {dimension_numbers = #tpu.dot_dimension_numbers<[1], [0], [0], [1], [0, 0, 1, 1], [], []>} : vector<16x128xbf16>, vector<128x128xbf16>, vector<16x128xf32> -> vector<16x128xf32>
    %13 = arith.index_cast %c0_i32 : i32 to index
    %c0_9 = arith.constant 0 : index
    %c0_10 = arith.constant 0 : index
    %14 = vector.load %arg5[%13, %c0_9, %c0_10] : memref<4x1x128xf32, #tpu.memory_space<vmem>>, vector<1x1x128xf32>
    %15 = vector.shape_cast %14 : vector<1x1x128xf32> to vector<1x128xf32>
    %16 = vector.broadcast %15 : vector<1x128xf32> to vector<16x128xf32>
    %17 = arith.addf %12, %16 : vector<16x128xf32>
    %cst_11 = arith.constant 0.000000e+00 : f32
    %18 = vector.broadcast %cst_11 : f32 to vector<16x128xf32>
    %19 = arith.maximumf %17, %18 : vector<16x128xf32>
    %20 = arith.addf %19, %7 : vector<16x128xf32>
    %c1_i32 = arith.constant 1 : i32
    %21 = arith.truncf %20 : vector<16x128xf32> to vector<16x128xbf16>
    %22 = arith.index_cast %c1_i32 : i32 to index
    %c0_12 = arith.constant 0 : index
    %c0_13 = arith.constant 0 : index
    %23 = vector.load %arg4[%22, %c0_12, %c0_13] : memref<4x128x128xbf16, #tpu.memory_space<vmem>>, vector<1x128x128xbf16>
    %24 = vector.shape_cast %23 : vector<1x128x128xbf16> to vector<128x128xbf16>
    %cst_14 = arith.constant dense<0.000000e+00> : vector<16x128xf32>
    %25 = tpu.matmul %21, %24, %cst_14 {dimension_numbers = #tpu.dot_dimension_numbers<[1], [0], [0], [1], [0, 0, 1, 1], [], []>} : vector<16x128xbf16>, vector<128x128xbf16>, vector<16x128xf32> -> vector<16x128xf32>
    %26 = arith.index_cast %c1_i32 : i32 to index
    %c0_15 = arith.constant 0 : index
    %c0_16 = arith.constant 0 : index
    %27 = vector.load %arg5[%26, %c0_15, %c0_16] : memref<4x1x128xf32, #tpu.memory_space<vmem>>, vector<1x1x128xf32>
    %28 = vector.shape_cast %27 : vector<1x1x128xf32> to vector<1x128xf32>
    %29 = vector.broadcast %28 : vector<1x128xf32> to vector<16x128xf32>
    %30 = arith.addf %25, %29 : vector<16x128xf32>
    %cst_17 = arith.constant 0.000000e+00 : f32
    %31 = vector.broadcast %cst_17 : f32 to vector<16x128xf32>
    %32 = arith.maximumf %30, %31 : vector<16x128xf32>
    %33 = arith.addf %32, %20 : vector<16x128xf32>
    %c2_i32 = arith.constant 2 : i32
    %34 = arith.truncf %33 : vector<16x128xf32> to vector<16x128xbf16>
    %35 = arith.index_cast %c2_i32 : i32 to index
    %c0_18 = arith.constant 0 : index
    %c0_19 = arith.constant 0 : index
    %36 = vector.load %arg4[%35, %c0_18, %c0_19] : memref<4x128x128xbf16, #tpu.memory_space<vmem>>, vector<1x128x128xbf16>
    %37 = vector.shape_cast %36 : vector<1x128x128xbf16> to vector<128x128xbf16>
    %cst_20 = arith.constant dense<0.000000e+00> : vector<16x128xf32>
    %38 = tpu.matmul %34, %37, %cst_20 {dimension_numbers = #tpu.dot_dimension_numbers<[1], [0], [0], [1], [0, 0, 1, 1], [], []>} : vector<16x128xbf16>, vector<128x128xbf16>, vector<16x128xf32> -> vector<16x128xf32>
    %39 = arith.index_cast %c2_i32 : i32 to index
    %c0_21 = arith.constant 0 : index
    %c0_22 = arith.constant 0 : index
    %40 = vector.load %arg5[%39, %c0_21, %c0_22] : memref<4x1x128xf32, #tpu.memory_space<vmem>>, vector<1x1x128xf32>
    %41 = vector.shape_cast %40 : vector<1x1x128xf32> to vector<1x128xf32>
    %42 = vector.broadcast %41 : vector<1x128xf32> to vector<16x128xf32>
    %43 = arith.addf %38, %42 : vector<16x128xf32>
    %cst_23 = arith.constant 0.000000e+00 : f32
    %44 = vector.broadcast %cst_23 : f32 to vector<16x128xf32>
    %45 = arith.maximumf %43, %44 : vector<16x128xf32>
    %46 = arith.addf %45, %33 : vector<16x128xf32>
    %c3_i32 = arith.constant 3 : i32
    %47 = arith.truncf %46 : vector<16x128xf32> to vector<16x128xbf16>
    %48 = arith.index_cast %c3_i32 : i32 to index
    %c0_24 = arith.constant 0 : index
    %c0_25 = arith.constant 0 : index
    %49 = vector.load %arg4[%48, %c0_24, %c0_25] : memref<4x128x128xbf16, #tpu.memory_space<vmem>>, vector<1x128x128xbf16>
    %50 = vector.shape_cast %49 : vector<1x128x128xbf16> to vector<128x128xbf16>
    %cst_26 = arith.constant dense<0.000000e+00> : vector<16x128xf32>
    %51 = tpu.matmul %47, %50, %cst_26 {dimension_numbers = #tpu.dot_dimension_numbers<[1], [0], [0], [1], [0, 0, 1, 1], [], []>} : vector<16x128xbf16>, vector<128x128xbf16>, vector<16x128xf32> -> vector<16x128xf32>
    %52 = arith.index_cast %c3_i32 : i32 to index
    %c0_27 = arith.constant 0 : index
    %c0_28 = arith.constant 0 : index
    %53 = vector.load %arg5[%52, %c0_27, %c0_28] : memref<4x1x128xf32, #tpu.memory_space<vmem>>, vector<1x1x128xf32>
    %54 = vector.shape_cast %53 : vector<1x1x128xf32> to vector<1x128xf32>
    %55 = vector.broadcast %54 : vector<1x128xf32> to vector<16x128xf32>
    %56 = arith.addf %51, %55 : vector<16x128xf32>
    %cst_29 = arith.constant 0.000000e+00 : f32
    %57 = vector.broadcast %cst_29 : f32 to vector<16x128xf32>
    %58 = arith.maximumf %56, %57 : vector<16x128xf32>
    %59 = arith.addf %58, %46 : vector<16x128xf32>
    %c4_i32 = arith.constant 4 : i32
    %60 = arith.truncf %59 : vector<16x128xf32> to vector<16x128xbf16>
    %c0_30 = arith.constant 0 : index
    %c0_31 = arith.constant 0 : index
    %61 = vector.load %arg6[%c0_30, %c0_31] : memref<128x128xbf16, #tpu.memory_space<vmem>>, vector<128x128xbf16>
    %cst_32 = arith.constant dense<0.000000e+00> : vector<16x128xf32>
    %62 = tpu.matmul %60, %61, %cst_32 {dimension_numbers = #tpu.dot_dimension_numbers<[1], [0], [0], [1], [0, 0, 1, 1], [], []>} : vector<16x128xbf16>, vector<128x128xbf16>, vector<16x128xf32> -> vector<16x128xf32>
    %c0_33 = arith.constant 0 : index
    %c0_34 = arith.constant 0 : index
    %63 = vector.load %arg7[%c0_33, %c0_34] : memref<1x128xf32, #tpu.memory_space<vmem>>, vector<1x128xf32>
    %64 = vector.broadcast %63 : vector<1x128xf32> to vector<16x128xf32>
    %65 = arith.addf %62, %64 : vector<16x128xf32>
    %c0_35 = arith.constant 0 : index
    %c0_36 = arith.constant 0 : index
    %66 = vector.load %arg8[%c0_35, %c0_36] : memref<16x128xf32, #tpu.memory_space<vmem>>, vector<16x128xf32>
    tpu.vector_store %arg8[%c0_35, %c0_36], %65 {strides = array<i32>} : memref<16x128xf32, #tpu.memory_space<vmem>>, vector<16x128xf32>,
    return
  }
  func.func @transform_0(%arg0: i32) -> (i32, i32) {
    %c0_i32 = arith.constant 0 : i32
    %c0_i32_0 = arith.constant 0 : i32
    return %arg0, %c0_i32 : i32, i32
  }
  func.func @transform_1(%arg0: i32) -> (i32, i32) {
    %c0_i32 = arith.constant 0 : i32
    %c0_i32_0 = arith.constant 0 : i32
    %c0_i32_1 = arith.constant 0 : i32
    return %c0_i32, %c0_i32_0 : i32, i32
  }
  func.func @transform_2(%arg0: i32) -> (i32, i32) {
    %c0_i32 = arith.constant 0 : i32
    %c0_i32_0 = arith.constant 0 : i32
    %c0_i32_1 = arith.constant 0 : i32
    return %c0_i32, %c0_i32_0 : i32, i32
  }
  func.func @transform_3(%arg0: i32) -> (i32, i32, i32) {
    %c0_i32 = arith.constant 0 : i32
    %c0_i32_0 = arith.constant 0 : i32
    %c0_i32_1 = arith.constant 0 : i32
    %c0_i32_2 = arith.constant 0 : i32
    return %c0_i32, %c0_i32_0, %c0_i32_1 : i32, i32, i32
  }
  func.func @transform_4(%arg0: i32) -> (i32, i32, i32) {
    %c0_i32 = arith.constant 0 : i32
    %c0_i32_0 = arith.constant 0 : i32
    %c0_i32_1 = arith.constant 0 : i32
    %c0_i32_2 = arith.constant 0 : i32
    return %c0_i32, %c0_i32_0, %c0_i32_1 : i32, i32, i32
  }
  func.func @transform_5(%arg0: i32) -> (i32, i32) {
    %c0_i32 = arith.constant 0 : i32
    %c0_i32_0 = arith.constant 0 : i32
    %c0_i32_1 = arith.constant 0 : i32
    return %c0_i32, %c0_i32_0 : i32, i32
  }
  func.func @transform_6(%arg0: i32) -> (i32, i32) {
    %c0_i32 = arith.constant 0 : i32
    %c0_i32_0 = arith.constant 0 : i32
    %c0_i32_1 = arith.constant 0 : i32
    return %c0_i32, %c0_i32_0 : i32, i32
  }
  func.func @transform_7(%arg0: i32) -> (i32, i32) {
    %c0_i32 = arith.constant 0 : i32
    %c0_i32_0 = arith.constant 0 : i32
    return %arg0, %c0_i32 : i32, i32
  }
}

</mosaic_0001>

<bundles_post_ra>
// kernel: tpu_custom_call.1
= control target key start
LH: loop header
LB: loop body
LE: loop exit
PB: predicated region body
PF: predicated region fallthrough
CT: control target
= control target key end

     0   :  { %12 = vsyncpa [#allocation3], 0  ;;  %s1160_s0 = inlined_call_operand.hbm [shape: bf16[16,128], index: 0, kind: input, shape index: {}]   ;;  %s1161_s1 = inlined_call_operand.hbm [shape: bf16[128,128], index: 1, kind: input, shape index: {}]   ;;  %s1162_s2 = inlined_call_operand.vmem [shape: f32[1,128], index: 2, kind: input, shape index: {}]   ;;  %s1163_s3 = inlined_call_operand.hbm [shape: bf16[4,128,128], index: 3, kind: input, shape index: {}]   ;;  %s1164_s4 = inlined_call_operand.hbm [shape: f32[4,1,128], index: 4, kind: input, shape index: {}]   ;;  %s1165_s5 = inlined_call_operand.hbm [shape: bf16[128,128], index: 5, kind: input, shape index: {}]   ;;  %s1166_s6 = inlined_call_operand.vmem [shape: f32[1,128], index: 6, kind: input, shape index: {}]   ;;  %s1167_s7 = inlined_call_operand.hbm [shape: f32[16,128], index: 7, kind: output, shape index: {}]  }
   0x1   :  { %13 = vsyncpa [#allocation6], 0 }
   0x2   :  { %14 = vsyncpa [#allocation9], 0 }
   0x3   :  { %15 = vsyncpa [#allocation4], 0  ;;  %s33_s26 = sshll.u32 %s1161_s1, 4  ;;  %s1072_s27 = smov [#allocation5]   ;;  %s34_s26 = int_to_ptr.hbm [resolvable:$true] %s33_s26 }
   0x4   :  { %s35_s28 = sshll.u32 %s1072_s27, 4  ;;  %s61_s8 = sshll.u32 %s1164_s4, 4  ;;  %s36_s28 = int_to_ptr.vmem [resolvable:$true] %s35_s28  ;;  %s62_s8 = int_to_ptr.hbm [resolvable:$true] %s61_s8 }
   0x5   :  { %s1073_s9 = smov 64   ;;  %s1074_s10 = smov 4  }
   0x6   :  { %41 = dma.hbm_to_vmem [thread:$0]  %s34_s26, 1024, %s36_s28, [#allocation6], %s1073_s9, %s1073_s9, %s1074_s10  }
   0x7   :  { %s1075_s11 = smov [#allocation8]   ;;  %s1076_s13 = smov 16  }
   0x8   :  { %s63_s12 = sshll.u32 %s1075_s11, 4  ;;  %s1077_s1 = smov 1   ;;  %s64_s12 = int_to_ptr.vmem [resolvable:$true] %s63_s12 }
   0x9   :  { %69 = dma.hbm_to_vmem [thread:$0]  %s62_s8, 64, %s64_s12, [#allocation9], %s1076_s13, %s1076_s13, %s1077_s1  }
   0xa   :  { %s20_s16 = sshll.u32 %s1160_s0, 4  ;;  %s1078_s17 = smov [#allocation2]   ;;  %s21_s16 = int_to_ptr.hbm [resolvable:$true] %s20_s16 }
   0xb   :  { %s22_s4 = sshll.u32 %s1078_s17, 4  ;;  %s48_s20 = sshll.u32 %s1163_s3, 4  ;;  %s23_s4 = int_to_ptr.vmem [resolvable:$true] %s22_s4  ;;  %s49_s20 = int_to_ptr.hbm [resolvable:$true] %s48_s20 }
   0xc   :  { %28 = dma.hbm_to_vmem [thread:$0]  %s21_s16, 128, %s23_s4, [#allocation3], %s1073_s9, %s1073_s9, %s1074_s10  }
   0xd   :  { %s1079_s21 = smov [#allocation7]   ;;  %s74_s25 = sshll.u32 %s1165_s5, 4  ;;  %s75_s25 = int_to_ptr.hbm [resolvable:$true] %s74_s25 }
   0xe   :  { %s50_s22 = sshll.u32 %s1079_s21, 4  ;;  %s1080_s0 = smov [#allocation10]   ;;  %s51_s22 = int_to_ptr.vmem [resolvable:$true] %s50_s22 }
   0xf   :  { %56 = dma.hbm_to_vmem [thread:$0]  %s49_s20, 4096, %s51_s22, [#allocation6], %s1073_s9, %s1073_s9, %s1074_s10  }
  0x10   :  { %s76_s26 = sshll.u32 %s1080_s0, 4  ;;  %s77_s26 = int_to_ptr.vmem [resolvable:$true] %s76_s26 }
  0x11   :  { %82 = dma.hbm_to_vmem [thread:$0]  %s75_s25, 1024, %s77_s26, [#allocation9], %s1073_s9, %s1073_s9, %s1074_s10  }
  0x12   :  { %1064 = dma.done.wait [#allocation3], 128  }
  0x13   :  { %1065 = vsyncadd [#allocation3], 4294967168 }
  0x14   :  { %1066 = dma.done.wait [#allocation6], 5120  }
  0x15   :  { %1067 = vsyncadd [#allocation6], 4294962176 }
  0x16   :  { %1068 = dma.done.wait [#allocation9], 1088  }
  0x17   :  { %1069 = vsyncadd [#allocation9], 4294966208  ;;  %v861_v0 = vld [vmem:[#allocation5 + $0x38] sm:$0xff]  ;;  %v860_v1 = vld [vmem:[#allocation5 + $0x30] sm:$0xff]  ;;  %s1081_s28 = smov [#allocation11]   ;;  %s642_s9 = sshll.u32 %s1167_s7, 4  ;;  %s643_s9 = int_to_ptr.hbm [resolvable:$true] %s642_s9 }
  0x18   :  { %181 = vmatpush.bf16.msra.mxu0 %v861_v0  ;;  %v869_v2 = vld [vmem:[#allocation7 + $0x38] sm:$0xff]  ;;  %v868_v3 = vld [vmem:[#allocation7 + $0x30] sm:$0xff]  ;;  %v859_v4 = vld [vmem:[#allocation5 + $0x28] sm:$0xff]  ;;  %s640_s29 = sshll.u32 %s1081_s28, 4  ;;  %s1082_s10 = smov 128   ;;  %s641_s29 = int_to_ptr.vmem [resolvable:$true] %s640_s29 }
  0x19   :  { %266 = vmatpush.bf16.msra.mxu1 %v869_v2  ;;  %v867_v5 = vld [vmem:[#allocation7 + $0x28] sm:$0xff]  ;;  %v858_v6 = vld [vmem:[#allocation5 + $0x20] sm:$0xff]  ;;  %v857_v8 = vld [vmem:[#allocation5 + $0x18] sm:$0xff]  ;;  %s1083_s11 = smov 8  }
  0x1a   :  { %v866_v7 = vld [vmem:[#allocation7 + $0x20] sm:$0xff]  ;;  %v856_v9 = vld [vmem:[#allocation5 + $0x10] sm:$0xff]  ;;  %v855_v10 = vld [vmem:[#allocation5 + $0x8] sm:$0xff] }
  0x1b   :  { %v854_v11 = vld [vmem:[#allocation5] sm:$0xff]  ;;  %v853_v12 = vld [vmem:[#allocation2] sm:$0xff]  ;;  %v864_v14 = vld [vmem:[#allocation7 + $0x10] sm:$0xff] }
  0x1c   :  { %182 = vmatpush.bf16.msra.mxu0 %v860_v1  ;;  %v865_v13 = vld [vmem:[#allocation7 + $0x18] sm:$0xff]  ;;  %v863_v15 = vld [vmem:[#allocation7 + $0x8] sm:$0xff]  ;;  %v862_v16 = vld [vmem:[#allocation7] sm:$0xff] }
  0x1d   :  { %267 = vmatpush.bf16.msra.mxu1 %v868_v3  ;;  %v877_v17 = vld [vmem:[#allocation7 + $0x78] sm:$0xff]  ;;  %v876_v18 = vld [vmem:[#allocation7 + $0x70] sm:$0xff]  ;;  %v875_v19 = vld [vmem:[#allocation7 + $0x68] sm:$0xff] }
  0x1e   :  { %355 = vmatpush.bf16.msra.mxu2 %v877_v17  ;;  %v874_v20 = vld [vmem:[#allocation7 + $0x60] sm:$0xff]  ;;  %v914_v22 = vld [vmem:[%s1162_s2] ss:$0 sm:$0xff]  ;;  %v872_v30 = vld [vmem:[#allocation7 + $0x50] sm:$0xff] }
  0x1f   :  { %v873_v29 = vld [vmem:[#allocation7 + $0x58] sm:$0xff]  ;;  %v871_v31 = vld [vmem:[#allocation7 + $0x48] sm:$0xff]  ;;  %v870_v32 = vld [vmem:[#allocation7 + $0x40] sm:$0xff] }
  0x20   :  { %183 = vmatpush.bf16.msra.mxu0 %v859_v4  ;;  %v885_v33 = vld [vmem:[#allocation7 + $0xb8] sm:$0xff]  ;;  %v884_v34 = vld [vmem:[#allocation7 + $0xb0] sm:$0xff]  ;;  %v883_v35 = vld [vmem:[#allocation7 + $0xa8] sm:$0xff] }
  0x21   :  { %268 = vmatpush.bf16.msra.mxu1 %v867_v5  ;;  %444 = vmatpush.bf16.msra.mxu3 %v885_v33  ;;  %v882_v36 = vld [vmem:[#allocation7 + $0xa0] sm:$0xff]  ;;  %v881_v47 = vld [vmem:[#allocation7 + $0x98] sm:$0xff]  ;;  %v880_v48 = vld [vmem:[#allocation7 + $0x90] sm:$0xff] }
  0x22   :  { %356 = vmatpush.bf16.msra.mxu2 %v876_v18  ;;  %v915_v38 = vld [vmem:[#allocation8] ss:$0 sm:$0xff]  ;;  %v879_v49 = vld [vmem:[#allocation7 + $0x88] sm:$0xff]  ;;  %v893_v51 = vld [vmem:[#allocation7 + $0xf8] sm:$0xff] }
  0x23   :  { %v878_v50 = vld [vmem:[#allocation7 + $0x80] sm:$0xff]  ;;  %v892_v52 = vld [vmem:[#allocation7 + $0xf0] sm:$0xff]  ;;  %v891_v53 = vld [vmem:[#allocation7 + $0xe8] sm:$0xff] }
  0x24   :  { %184 = vmatpush.bf16.msra.mxu0 %v858_v6  ;;  %v890_v54 = vld [vmem:[#allocation7 + $0xe0] sm:$0xff]  ;;  %v889_v1 = vld [vmem:[#allocation7 + $0xd8] sm:$0xff]  ;;  %v888_v2 = vld [vmem:[#allocation7 + $0xd0] sm:$0xff] }
  0x25   :  { %269 = vmatpush.bf16.msra.mxu1 %v866_v7  ;;  %445 = vmatpush.bf16.msra.mxu3 %v884_v34  ;;  %v916_v56 = vld [vmem:[#allocation8 + $0x1] ss:$0 sm:$0xff]  ;;  %v887_v3 = vld [vmem:[#allocation7 + $0xc8] sm:$0xff]  ;;  %v900_v6 = vld [vmem:[#allocation10 + $0x30] sm:$0xff] }
  0x26   :  { %357 = vmatpush.bf16.msra.mxu2 %v875_v19  ;;  %v886_v4 = vld [vmem:[#allocation7 + $0xc0] sm:$0xff]  ;;  %v899_v7 = vld [vmem:[#allocation10 + $0x28] sm:$0xff]  ;;  %v919_v33 = vld [vmem:[%s1166_s6] ss:$0 sm:$0xff] }
  0x27   :  { %v901_v5 = vld [vmem:[#allocation10 + $0x38] sm:$0xff] }
  0x28   :  { %185 = vmatpush.bf16.msra.mxu0 %v857_v8  ;;  %v898_v8 = vld [vmem:[#allocation10 + $0x20] sm:$0xff]  ;;  %v897_v19 = vld [vmem:[#allocation10 + $0x18] sm:$0xff] }
  0x29   :  { %270 = vmatpush.bf16.msra.mxu1 %v865_v13  ;;  %446 = vmatpush.bf16.msra.mxu3 %v883_v35 }
  0x2a   :  { %358 = vmatpush.bf16.msra.mxu2 %v874_v20  ;;  %v896_v20 = vld [vmem:[#allocation10 + $0x10] sm:$0xff] }
  0x2c   :  { %186 = vmatpush.bf16.msra.mxu0 %v856_v9 }
  0x2d   :  { %271 = vmatpush.bf16.msra.mxu1 %v864_v14  ;;  %447 = vmatpush.bf16.msra.mxu3 %v882_v36 }
  0x2e   :  { %359 = vmatpush.bf16.msra.mxu2 %v873_v29 }
  0x30   :  { %187 = vmatpush.bf16.msra.mxu0 %v855_v10  ;;  %v917_v10 = vld [vmem:[#allocation8 + $0x2] ss:$0 sm:$0xff] }
  0x31   :  { %272 = vmatpush.bf16.msra.mxu1 %v863_v15  ;;  %448 = vmatpush.bf16.msra.mxu3 %v881_v47 }
  0x32   :  { %360 = vmatpush.bf16.msra.mxu2 %v872_v30 }
  0x34   :  { %188 = vmatpush.bf16.msra.mxu0 %v854_v11 }
  0x35   :  { %273 = vmatpush.bf16.msra.mxu1 %v862_v16  ;;  %449 = vmatpush.bf16.msra.mxu3 %v880_v48 }
  0x36   :  { %361 = vmatpush.bf16.msra.mxu2 %v871_v31 }
  0x37   :  { %189 = vmatmul.bf16.vlgmr.msra.gmra.mxu0 %v853_v12 }
  0x38   :  { %533 = vmatpush.bf16.msrb.mxu0 %v893_v51 }
  0x39   :  { %450 = vmatpush.bf16.msra.mxu3 %v879_v49  ;;  %620 = vmatpush.bf16.msrb.mxu1 %v901_v5 }
  0x3a   :  { %362 = vmatpush.bf16.msra.mxu2 %v870_v32 }
  0x3c   :  { %534 = vmatpush.bf16.msrb.mxu0 %v892_v52 }
  0x3d   :  { %451 = vmatpush.bf16.msra.mxu3 %v878_v50  ;;  %621 = vmatpush.bf16.msrb.mxu1 %v900_v6 }
  0x40   :  { %535 = vmatpush.bf16.msrb.mxu0 %v891_v53 }
  0x41   :  { %622 = vmatpush.bf16.msrb.mxu1 %v899_v7 }
  0x44   :  { %536 = vmatpush.bf16.msrb.mxu0 %v890_v54 }
  0x45   :  { %623 = vmatpush.bf16.msrb.mxu1 %v898_v8 }
  0x48   :  { %537 = vmatpush.bf16.msrb.mxu0 %v889_v1 }
  0x49   :  { %624 = vmatpush.bf16.msrb.mxu1 %v897_v19 }
  0x4c   :  { %538 = vmatpush.bf16.msrb.mxu0 %v888_v2 }
  0x4d   :  { %625 = vmatpush.bf16.msrb.mxu1 %v896_v20 }
  0x50   :  { %539 = vmatpush.bf16.msrb.mxu0 %v887_v3 }
  0x54   :  { %540 = vmatpush.bf16.msrb.mxu0 %v886_v4 }
  0xb4   :  { %v190_v21 = vpop.f32.mrf.mxu0 }
  0xb5   :  { %v191_v23 = vadd.f32 %v914_v22, %v190_v21  ;;  %v895_v21 = vld [vmem:[#allocation10 + $0x8] sm:$0xff] }
  0xb6   :  { %626 = vmatpush.bf16.msrb.mxu1 %v895_v21 }
  0xb7   :  { %v195_v26 = vmax.f32 %v191_v23, 0.0 }
  0xbc   :  { %v192_v24 = vpop.f32.mrf.mxu0 }
  0xbd   :  { %v193_v25 = vadd.f32 %v914_v22, %v192_v24  ;;  %v894_v22 = vld [vmem:[#allocation10] sm:$0xff]  ;;  %v918_v24 = vld [vmem:[#allocation8 + $0x3] ss:$0 sm:$0xff] }
  0xbe   :  { %627 = vmatpush.bf16.msrb.mxu1 %v894_v22 }
  0xbf   :  { %v196_v27 = vmax.f32 %v193_v25, 0.0 }
  0xc1   :  { %v197_v28 = vpack.c.bf16 %v196_v27, %v195_v26 }
  0xc3   :  { %274 = vmatmul.bf16.vlgmr.msra.gmra.mxu1 %v197_v28 }
 0x140   :  { %v275_v37 = vpop.f32.mrf.mxu1 }
 0x141   :  { %v276_v39 = vadd.f32 %v915_v38, %v275_v37 }
 0x143   :  { %v280_v41 = vmax.f32 %v276_v39, 0.0 }
 0x145   :  { %v282_v44 = vadd.f32 %v280_v41, %v195_v26 }
 0x148   :  { %v277_v40 = vpop.f32.mrf.mxu1 }
 0x149   :  { %v278_v42 = vadd.f32 %v915_v38, %v277_v40 }
 0x14b   :  { %v281_v43 = vmax.f32 %v278_v42, 0.0 }
 0x14d   :  { %v283_v45 = vadd.f32 %v281_v43, %v196_v27 }
 0x14f   :  { %v284_v46 = vpack.c.bf16 %v283_v45, %v282_v44 }
 0x151   :  { %363 = vmatmul.bf16.vlgmr.msra.gmra.mxu2 %v284_v46 }
 0x1d4   :  { %v364_v55 = vpop.f32.mrf.mxu2 }
 0x1d5   :  { %v365_v57 = vadd.f32 %v916_v56, %v364_v55 }
 0x1d7   :  { %v369_v59 = vmax.f32 %v365_v57, 0.0 }
 0x1d9   :  { %v371_v62 = vadd.f32 %v369_v59, %v282_v44 }
 0x1dc   :  { %v366_v58 = vpop.f32.mrf.mxu2 }
 0x1dd   :  { %v367_v60 = vadd.f32 %v916_v56, %v366_v58 }
 0x1df   :  { %v370_v61 = vmax.f32 %v367_v60, 0.0 }
 0x1e1   :  { %v372_v63 = vadd.f32 %v370_v61, %v283_v45 }
 0x1e3   :  { %v373_v0 = vpack.c.bf16 %v372_v63, %v371_v62 }
 0x1e5   :  { %452 = vmatmul.bf16.vlgmr.msra.gmra.mxu3 %v373_v0 }
 0x268   :  { %v453_v9 = vpop.f32.mrf.mxu3 }
 0x269   :  { %v454_v11 = vadd.f32 %v917_v10, %v453_v9 }
 0x26b   :  { %v458_v13 = vmax.f32 %v454_v11, 0.0 }
 0x26d   :  { %v460_v16 = vadd.f32 %v458_v13, %v371_v62 }
 0x270   :  { %v455_v12 = vpop.f32.mrf.mxu3 }
 0x271   :  { %v456_v14 = vadd.f32 %v917_v10, %v455_v12 }
 0x273   :  { %v459_v15 = vmax.f32 %v456_v14, 0.0 }
 0x275   :  { %v461_v17 = vadd.f32 %v459_v15, %v372_v63 }
 0x277   :  { %v462_v18 = vpack.c.bf16 %v461_v17, %v460_v16 }
 0x279   :  { %541 = vmatmul.bf16.vlgmr.msrb.gmra.mxu0 %v462_v18 }
 0x2f6   :  { %v542_v23 = vpop.f32.mrf.mxu0 }
 0x2f7   :  { %v543_v25 = vadd.f32 %v918_v24, %v542_v23 }
 0x2f9   :  { %v547_v27 = vmax.f32 %v543_v25, 0.0 }
 0x2fb   :  { %v549_v30 = vadd.f32 %v547_v27, %v460_v16 }
 0x2fe   :  { %v544_v26 = vpop.f32.mrf.mxu0 }
 0x2ff   :  { %v545_v28 = vadd.f32 %v918_v24, %v544_v26 }
 0x301   :  { %v548_v29 = vmax.f32 %v545_v28, 0.0 }
 0x303   :  { %v550_v31 = vadd.f32 %v548_v29, %v461_v17 }
 0x305   :  { %v551_v32 = vpack.c.bf16 %v550_v31, %v549_v30 }
 0x307   :  { %628 = vmatmul.bf16.vlgmr.msrb.gmra.mxu1 %v551_v32 }
 0x384   :  { %v629_v34 = vpop.f32.mrf.mxu1 }
 0x385   :  { %v630_v35 = vadd.f32 %v919_v33, %v629_v34 }
 0x387   :  { %634 = vst [vmem:[#allocation11] sm:$0xff] %v630_v35 }
 0x38c   :  { %v631_v36 = vpop.f32.mrf.mxu1 }
 0x38d   :  { %v632_v37 = vadd.f32 %v919_v33, %v631_v36 }
 0x38f   :  { %635 = vst [vmem:[#allocation11 + $0x8] sm:$0xff] %v632_v37 }
 0x390   :  { %648 = dma.vmem_to_hbm [thread:$0]  %s641_s29, 256, %s643_s9, [#allocation4], %s1082_s10, %s1082_s10, %s1083_s11  }
 0x391   :  { %1070 = dma.done.wait [#allocation4], 256  }
 0x392   :  { %1071 = vsyncadd [#allocation4], 4294967040 }
 0x393   :  { %653 = vsyncpa [#allocation3], 1 }
 0x394   :  { %654 = vsyncpa [#allocation6], 1 }
 0x395   :  { %655 = vsyncpa [#allocation9], 1 }
 0x396   :  { %656 = vsyncpa [#allocation4], 1 }

</bundles_post_ra>
